<compile_context>
chip_gen: v7x
topology: tpu7x:2x2x1
jax: 0.10.0
libtpu: 0.0.40
codegen_flags: <defaults>
</compile_context>

<pallas_src>
import jax
import jax.numpy as jnp
from jax import lax
from jax.experimental import pallas as pl
from jax.experimental.pallas import tpu as pltpu

K_SIZE = 5      # Conv1d kernel_size
F_OUT = 128     # Conv1d output channels

_UNROLL_MAX = 512   # fully unroll the time loop up to this many conv positions


def _round_up(x, m):
    return (x + m - 1) // m * m


def q6_4_forward(x_ids, embed_w, conv_w, conv_b, fc_w, fc_b):
    """x_ids: (N, H) int32 token ids. Returns (N, 1) float32 probabilities."""
    # TODO(synk): embedding gather kept in plain JAX (data-dependent gather);
    # moving it in-kernel (VMEM-resident table + gather) would remove the HBM
    # round trip of the (N, H, E) activations.
    z = embed_w[x_ids].astype(jnp.float32)                 # (N, H, E)
    N, H, E = z.shape
    F, E2, K = conv_w.shape
    assert E2 == E
    L = H - K + 1                                          # valid conv positions
    assert L >= 1, "sequence shorter than conv kernel"

    # Batch tile: do not pad tiny batches up to 128 (64x wasted work before),
    # and cap TN so the double-buffered z block stays well inside scoped VMEM.
    TN = min(128, _round_up(N, 8))

    def _z_block_bytes(tn):
        return tn * _round_up(H * E, 128) * 2              # bf16, lane-rounded

    while TN > 8 and 2 * _z_block_bytes(TN) > 16 * 1024 * 1024:
        TN = max(8, _round_up(TN // 2, 8))

    GB = pl.cdiv(N, TN)                                    # batch grid ("parallel")
    Np = GB * TN
    # NOTE: on v7x (2 TensorCores) GB == 1 leaves one core idle; acceptable for
    # the small batches this module targets.

    # Lane-dense activations: (Np, H*E) bf16.  The im2col row for conv position
    # j is the contiguous slice [:, j*E : j*E + K*E] -- no scratch, no packing.
    z_flat = (jnp.pad(z, ((0, Np - N), (0, 0), (0, 0)))
              .reshape(Np, H * E).astype(jnp.bfloat16))
    w_im2col = (jnp.transpose(conv_w, (2, 1, 0))           # (F,E,K) -> (K,E,F)
                .reshape(K * E, F).astype(jnp.bfloat16))   # rhs of the 160-deep dot
    b = conv_b.reshape(1, F).astype(jnp.float32)
    fcw = fc_w.reshape(1, F).astype(jnp.float32)
    fcb = fc_b.reshape(1, 1).astype(jnp.float32)

    def kernel(z_ref, w_ref, b_ref, fcw_ref, fcb_ref, out_ref):
        w = w_ref[...]                                     # (K*E, F) bf16, hoisted
        mmax = jnp.full((TN, F), -jnp.inf, jnp.float32)    # running max over time

        def step(lhs, m):
            # One 160-deep MXU dot; the (TN, F) f32 result stays in registers
            # and is folded immediately into the running max (no VMEM round trip).
            c = jnp.dot(lhs, w, preferred_element_type=jnp.float32)
            return jnp.maximum(m, c)

        if L <= _UNROLL_MAX:
            for j in range(L):                             # static lane offsets
                mmax = step(z_ref[:, j * E:(j + K) * E], mmax)
        else:
            # TODO(synk): long-sequence path uses a dynamic minor-dim slice;
            # not exercised by the small test below.
            def body(j, m):
                return step(z_ref[:, pl.ds(j * E, K * E)], m)
            mmax = lax.fori_loop(0, L, body, mmax)

        # Conv bias after the max (exact: bias constant over time), ReLU, then
        # the F->1 linear layer as a VPU multiply + lane reduce (no M=1 matmul).
        m = jnp.maximum(mmax + b_ref[...], 0.0)            # (TN, F) f32
        logits = jnp.sum(m * fcw_ref[...], axis=1, keepdims=True)   # (TN, 1)
        out_ref[...] = jax.nn.sigmoid(logits + fcb_ref[...])

    out = pl.pallas_call(
        kernel,
        out_shape=jax.ShapeDtypeStruct((Np, 1), jnp.float32),
        grid=(GB,),
        in_specs=[
            pl.BlockSpec((TN, H * E), lambda i: (i, 0)),   # z: one slab per batch tile
            pl.BlockSpec((K * E, F), lambda i: (0, 0)),    # conv weight (grid-resident)
            pl.BlockSpec((1, F), lambda i: (0, 0)),        # conv bias   (grid-resident)
            pl.BlockSpec((1, F), lambda i: (0, 0)),        # fc weight   (grid-resident)
            pl.BlockSpec((1, 1), lambda i: (0, 0)),        # fc bias     (grid-resident)
        ],
        out_specs=pl.BlockSpec((TN, 1), lambda i: (i, 0)),
        compiler_params=pltpu.CompilerParams(
            dimension_semantics=("parallel",),
            vmem_limit_bytes=32 * 1024 * 1024,
        ),
    )(z_flat, w_im2col, b, fcw, fcb)

    return out[:N]


def q6_4_reference(x_ids, embed_w, conv_w, conv_b, fc_w, fc_b):
    """Pure-JAX f32 reference mirroring the PyTorch forward."""
    z = embed_w[x_ids].astype(jnp.float32)                 # (N, H, E)
    N, H, E = z.shape
    F, _, K = conv_w.shape
    L = H - K + 1
    w_kef = jnp.transpose(conv_w, (2, 1, 0))               # (K, E, F)
    acc = jnp.zeros((N, L, F), jnp.float32)
    for k in range(K):
        acc = acc + jnp.einsum('nle,ef->nlf', z[:, k:k + L, :], w_kef[k])
    acc = acc + conv_b[None, None, :]
    m = jnp.maximum(jnp.max(acc, axis=1), 0.0)             # (N, F)
    logits = m @ fc_w.T + fc_b[None, :]                    # (N, 1)
    return jax.nn.sigmoid(logits)


if __name__ == "__main__":
    # Small shapes consistent with the module: vocab=50, embed_dim=32,
    # batch N=2, sequence length H=16 (> kernel_size=5).
    NUM_EMB, EMB_DIM = 50, 32
    N, H = 2, 16

    key = jax.random.PRNGKey(0)
    k_emb, k_cw, k_cb, k_fw, k_x = jax.random.split(key, 5)

    embed_w = jax.random.normal(k_emb, (NUM_EMB, EMB_DIM), jnp.float32) * 0.1
    conv_w = jax.random.normal(k_cw, (F_OUT, EMB_DIM, K_SIZE), jnp.float32) * 0.05
    conv_b = jax.random.normal(k_cb, (F_OUT,), jnp.float32) * 0.05
    fc_w = jax.random.normal(k_fw, (1, F_OUT), jnp.float32) * (1.0 / jnp.sqrt(F_OUT))
    fc_b = jnp.zeros((1,), jnp.float32)

    x = jax.random.randint(k_x, (N, H), 0, NUM_EMB, jnp.int32)

    out = jax.block_until_ready(q6_4_forward(x, embed_w, conv_w, conv_b, fc_w, fc_b))
    ref = jax.block_until_ready(q6_4_reference(x, embed_w, conv_w, conv_b, fc_w, fc_b))

    assert out.shape == (N, 1), out.shape
    # bf16 matmul operands vs f32 reference -> loose-but-tight-enough tolerance.
    assert jnp.allclose(out, ref, atol=2e-3, rtol=0.0), (out, ref)
    print("KERNEL_OK")
</pallas_src>

<mosaic_0001>
module attributes {stable_mosaic.version = 11 : i64} {
  func.func @kernel(%arg0: i32, %arg1: memref<8x512xbf16, #tpu.memory_space<vmem>>, %arg2: memref<160x128xbf16, #tpu.memory_space<vmem>>, %arg3: memref<1x128xf32, #tpu.memory_space<vmem>>, %arg4: memref<1x128xf32, #tpu.memory_space<vmem>>, %arg5: memref<1x1xf32, #tpu.memory_space<vmem>>, %arg6: memref<8x1xf32, #tpu.memory_space<vmem>>) attributes {dimension_semantics = [#tpu.dimension_semantics<parallel>], iteration_bounds = array<i64: 1>, scalar_prefetch = 0 : i64, scratch_operands = 0 : i64, tpu.core_type = #tpu.core_type<tc>, window_params = [{transform_indices = @transform_0, window_bounds = array<i64: 8, 512>}, {pipeline_mode = #tpu.pipeline_mode<synchronous>, transform_indices = @transform_1, window_bounds = array<i64: 160, 128>}, {pipeline_mode = #tpu.pipeline_mode<synchronous>, transform_indices = @transform_2, window_bounds = array<i64: 1, 128>}, {pipeline_mode = #tpu.pipeline_mode<synchronous>, transform_indices = @transform_3, window_bounds = array<i64: 1, 128>}, {pipeline_mode = #tpu.pipeline_mode<synchronous>, transform_indices = @transform_4, window_bounds = array<i64: 1, 1>}, {transform_indices = @transform_5, window_bounds = array<i64: 8, 1>}]} {
    %c0 = arith.constant 0 : index
    %c0_0 = arith.constant 0 : index
    %0 = vector.load %arg2[%c0, %c0_0] : memref<160x128xbf16, #tpu.memory_space<vmem>>, vector<160x128xbf16>
    %cst = arith.constant 0xFF800000 : f32
    %1 = vector.broadcast %cst : f32 to vector<8x128xf32>
    %c0_1 = arith.constant 0 : index
    %c0_2 = arith.constant 0 : index
    %2 = vector.load %arg1[%c0_1, %c0_2] : memref<8x512xbf16, #tpu.memory_space<vmem>>, vector<8x160xbf16>
    %cst_3 = arith.constant dense<0.000000e+00> : vector<8x128xf32>
    %3 = tpu.matmul %2, %0, %cst_3 {dimension_numbers = #tpu.dot_dimension_numbers<[1], [0], [0], [1], [0, 0, 1, 1], [], []>} : vector<8x160xbf16>, vector<160x128xbf16>, vector<8x128xf32> -> vector<8x128xf32>
    %4 = arith.maximumf %1, %3 : vector<8x128xf32>
    %c0_4 = arith.constant 0 : index
    %c32 = arith.constant 32 : index
    %5 = vector.load %arg1[%c0_4, %c32] : memref<8x512xbf16, #tpu.memory_space<vmem>>, vector<8x160xbf16>
    %cst_5 = arith.constant dense<0.000000e+00> : vector<8x128xf32>
    %6 = tpu.matmul %5, %0, %cst_5 {dimension_numbers = #tpu.dot_dimension_numbers<[1], [0], [0], [1], [0, 0, 1, 1], [], []>} : vector<8x160xbf16>, vector<160x128xbf16>, vector<8x128xf32> -> vector<8x128xf32>
    %7 = arith.maximumf %4, %6 : vector<8x128xf32>
    %c0_6 = arith.constant 0 : index
    %c64 = arith.constant 64 : index
    %8 = vector.load %arg1[%c0_6, %c64] : memref<8x512xbf16, #tpu.memory_space<vmem>>, vector<8x160xbf16>
    %cst_7 = arith.constant dense<0.000000e+00> : vector<8x128xf32>
    %9 = tpu.matmul %8, %0, %cst_7 {dimension_numbers = #tpu.dot_dimension_numbers<[1], [0], [0], [1], [0, 0, 1, 1], [], []>} : vector<8x160xbf16>, vector<160x128xbf16>, vector<8x128xf32> -> vector<8x128xf32>
    %10 = arith.maximumf %7, %9 : vector<8x128xf32>
    %c0_8 = arith.constant 0 : index
    %c96 = arith.constant 96 : index
    %11 = vector.load %arg1[%c0_8, %c96] : memref<8x512xbf16, #tpu.memory_space<vmem>>, vector<8x160xbf16>
    %cst_9 = arith.constant dense<0.000000e+00> : vector<8x128xf32>
    %12 = tpu.matmul %11, %0, %cst_9 {dimension_numbers = #tpu.dot_dimension_numbers<[1], [0], [0], [1], [0, 0, 1, 1], [], []>} : vector<8x160xbf16>, vector<160x128xbf16>, vector<8x128xf32> -> vector<8x128xf32>
    %13 = arith.maximumf %10, %12 : vector<8x128xf32>
    %c0_10 = arith.constant 0 : index
    %c128 = arith.constant 128 : index
    %14 = vector.load %arg1[%c0_10, %c128] : memref<8x512xbf16, #tpu.memory_space<vmem>>, vector<8x160xbf16>
    %cst_11 = arith.constant dense<0.000000e+00> : vector<8x128xf32>
    %15 = tpu.matmul %14, %0, %cst_11 {dimension_numbers = #tpu.dot_dimension_numbers<[1], [0], [0], [1], [0, 0, 1, 1], [], []>} : vector<8x160xbf16>, vector<160x128xbf16>, vector<8x128xf32> -> vector<8x128xf32>
    %16 = arith.maximumf %13, %15 : vector<8x128xf32>
    %c0_12 = arith.constant 0 : index
    %c160 = arith.constant 160 : index
    %17 = vector.load %arg1[%c0_12, %c160] : memref<8x512xbf16, #tpu.memory_space<vmem>>, vector<8x160xbf16>
    %cst_13 = arith.constant dense<0.000000e+00> : vector<8x128xf32>
    %18 = tpu.matmul %17, %0, %cst_13 {dimension_numbers = #tpu.dot_dimension_numbers<[1], [0], [0], [1], [0, 0, 1, 1], [], []>} : vector<8x160xbf16>, vector<160x128xbf16>, vector<8x128xf32> -> vector<8x128xf32>
    %19 = arith.maximumf %16, %18 : vector<8x128xf32>
    %c0_14 = arith.constant 0 : index
    %c192 = arith.constant 192 : index
    %20 = vector.load %arg1[%c0_14, %c192] : memref<8x512xbf16, #tpu.memory_space<vmem>>, vector<8x160xbf16>
    %cst_15 = arith.constant dense<0.000000e+00> : vector<8x128xf32>
    %21 = tpu.matmul %20, %0, %cst_15 {dimension_numbers = #tpu.dot_dimension_numbers<[1], [0], [0], [1], [0, 0, 1, 1], [], []>} : vector<8x160xbf16>, vector<160x128xbf16>, vector<8x128xf32> -> vector<8x128xf32>
    %22 = arith.maximumf %19, %21 : vector<8x128xf32>
    %c0_16 = arith.constant 0 : index
    %c224 = arith.constant 224 : index
    %23 = vector.load %arg1[%c0_16, %c224] : memref<8x512xbf16, #tpu.memory_space<vmem>>, vector<8x160xbf16>
    %cst_17 = arith.constant dense<0.000000e+00> : vector<8x128xf32>
    %24 = tpu.matmul %23, %0, %cst_17 {dimension_numbers = #tpu.dot_dimension_numbers<[1], [0], [0], [1], [0, 0, 1, 1], [], []>} : vector<8x160xbf16>, vector<160x128xbf16>, vector<8x128xf32> -> vector<8x128xf32>
    %25 = arith.maximumf %22, %24 : vector<8x128xf32>
    %c0_18 = arith.constant 0 : index
    %c256 = arith.constant 256 : index
    %26 = vector.load %arg1[%c0_18, %c256] : memref<8x512xbf16, #tpu.memory_space<vmem>>, vector<8x160xbf16>
    %cst_19 = arith.constant dense<0.000000e+00> : vector<8x128xf32>
    %27 = tpu.matmul %26, %0, %cst_19 {dimension_numbers = #tpu.dot_dimension_numbers<[1], [0], [0], [1], [0, 0, 1, 1], [], []>} : vector<8x160xbf16>, vector<160x128xbf16>, vector<8x128xf32> -> vector<8x128xf32>
    %28 = arith.maximumf %25, %27 : vector<8x128xf32>
    %c0_20 = arith.constant 0 : index
    %c288 = arith.constant 288 : index
    %29 = vector.load %arg1[%c0_20, %c288] : memref<8x512xbf16, #tpu.memory_space<vmem>>, vector<8x160xbf16>
    %cst_21 = arith.constant dense<0.000000e+00> : vector<8x128xf32>
    %30 = tpu.matmul %29, %0, %cst_21 {dimension_numbers = #tpu.dot_dimension_numbers<[1], [0], [0], [1], [0, 0, 1, 1], [], []>} : vector<8x160xbf16>, vector<160x128xbf16>, vector<8x128xf32> -> vector<8x128xf32>
    %31 = arith.maximumf %28, %30 : vector<8x128xf32>
    %c0_22 = arith.constant 0 : index
    %c320 = arith.constant 320 : index
    %32 = vector.load %arg1[%c0_22, %c320] : memref<8x512xbf16, #tpu.memory_space<vmem>>, vector<8x160xbf16>
    %cst_23 = arith.constant dense<0.000000e+00> : vector<8x128xf32>
    %33 = tpu.matmul %32, %0, %cst_23 {dimension_numbers = #tpu.dot_dimension_numbers<[1], [0], [0], [1], [0, 0, 1, 1], [], []>} : vector<8x160xbf16>, vector<160x128xbf16>, vector<8x128xf32> -> vector<8x128xf32>
    %34 = arith.maximumf %31, %33 : vector<8x128xf32>
    %c0_24 = arith.constant 0 : index
    %c352 = arith.constant 352 : index
    %35 = vector.load %arg1[%c0_24, %c352] : memref<8x512xbf16, #tpu.memory_space<vmem>>, vector<8x160xbf16>
    %cst_25 = arith.constant dense<0.000000e+00> : vector<8x128xf32>
    %36 = tpu.matmul %35, %0, %cst_25 {dimension_numbers = #tpu.dot_dimension_numbers<[1], [0], [0], [1], [0, 0, 1, 1], [], []>} : vector<8x160xbf16>, vector<160x128xbf16>, vector<8x128xf32> -> vector<8x128xf32>
    %37 = arith.maximumf %34, %36 : vector<8x128xf32>
    %c0_26 = arith.constant 0 : index
    %c0_27 = arith.constant 0 : index
    %38 = vector.load %arg3[%c0_26, %c0_27] : memref<1x128xf32, #tpu.memory_space<vmem>>, vector<1x128xf32>
    %39 = vector.broadcast %38 : vector<1x128xf32> to vector<8x128xf32>
    %40 = arith.addf %37, %39 : vector<8x128xf32>
    %cst_28 = arith.constant 0.000000e+00 : f32
    %41 = vector.broadcast %cst_28 : f32 to vector<8x128xf32>
    %42 = arith.maximumf %40, %41 : vector<8x128xf32>
    %c0_29 = arith.constant 0 : index
    %c0_30 = arith.constant 0 : index
    %43 = vector.load %arg4[%c0_29, %c0_30] : memref<1x128xf32, #tpu.memory_space<vmem>>, vector<1x128xf32>
    %44 = vector.broadcast %43 : vector<1x128xf32> to vector<8x128xf32>
    %45 = arith.mulf %42, %44 : vector<8x128xf32>
    %cst_31 = arith.constant dense<0.000000e+00> : vector<8xf32>
    %46 = vector.multi_reduction <add>, %45, %cst_31 [1] : vector<8x128xf32> to vector<8xf32>
    %47 = vector.shape_cast %46 : vector<8xf32> to vector<8x1xf32>
    %c0_32 = arith.constant 0 : index
    %c0_33 = arith.constant 0 : index
    %48 = vector.load %arg5[%c0_32, %c0_33] : memref<1x1xf32, #tpu.memory_space<vmem>>, vector<1x1xf32>
    %49 = vector.broadcast %48 : vector<1x1xf32> to vector<8x1xf32>
    %50 = arith.addf %47, %49 : vector<8x1xf32>
    %51 = arith.negf %50 : vector<8x1xf32>
    %52 = math.exp %51 : vector<8x1xf32>
    %cst_34 = arith.constant 1.000000e+00 : f32
    %53 = vector.broadcast %cst_34 : f32 to vector<8x1xf32>
    %54 = arith.addf %53, %52 : vector<8x1xf32>
    %55 = arith.divf %53, %54 : vector<8x1xf32>
    %c0_35 = arith.constant 0 : index
    %c0_36 = arith.constant 0 : index
    %56 = vector.load %arg6[%c0_35, %c0_36] : memref<8x1xf32, #tpu.memory_space<vmem>>, vector<8x1xf32>
    tpu.vector_store %arg6[%c0_35, %c0_36], %55 {strides = array<i32>} : memref<8x1xf32, #tpu.memory_space<vmem>>, vector<8x1xf32>,
    return
  }
  func.func @transform_0(%arg0: i32) -> (i32, i32) {
    %c0_i32 = arith.constant 0 : i32
    %c0_i32_0 = arith.constant 0 : i32
    return %arg0, %c0_i32 : i32, i32
  }
  func.func @transform_1(%arg0: i32) -> (i32, i32) {
    %c0_i32 = arith.constant 0 : i32
    %c0_i32_0 = arith.constant 0 : i32
    %c0_i32_1 = arith.constant 0 : i32
    return %c0_i32, %c0_i32_0 : i32, i32
  }
  func.func @transform_2(%arg0: i32) -> (i32, i32) {
    %c0_i32 = arith.constant 0 : i32
    %c0_i32_0 = arith.constant 0 : i32
    %c0_i32_1 = arith.constant 0 : i32
    return %c0_i32, %c0_i32_0 : i32, i32
  }
  func.func @transform_3(%arg0: i32) -> (i32, i32) {
    %c0_i32 = arith.constant 0 : i32
    %c0_i32_0 = arith.constant 0 : i32
    %c0_i32_1 = arith.constant 0 : i32
    return %c0_i32, %c0_i32_0 : i32, i32
  }
  func.func @transform_4(%arg0: i32) -> (i32, i32) {
    %c0_i32 = arith.constant 0 : i32
    %c0_i32_0 = arith.constant 0 : i32
    %c0_i32_1 = arith.constant 0 : i32
    return %c0_i32, %c0_i32_0 : i32, i32
  }
  func.func @transform_5(%arg0: i32) -> (i32, i32) {
    %c0_i32 = arith.constant 0 : i32
    %c0_i32_0 = arith.constant 0 : i32
    return %arg0, %c0_i32 : i32, i32
  }
}

</mosaic_0001>

<bundles_post_ra>
// kernel: tpu_custom_call.1
= control target key start
LH: loop header
LB: loop body
LE: loop exit
PB: predicated region body
PF: predicated region fallthrough
CT: control target
= control target key end

     0   :  { %s1297_s0 = inlined_call_operand.hbm [shape: bf16[8,512], index: 0, kind: input, shape index: {}]   ;;  %s1298_s1 = inlined_call_operand.hbm [shape: bf16[160,128], index: 1, kind: input, shape index: {}]   ;;  %s1299_s2 = inlined_call_operand.vmem [shape: f32[1,128], index: 2, kind: input, shape index: {}]   ;;  %s1300_s3 = inlined_call_operand.vmem [shape: f32[1,128], index: 3, kind: input, shape index: {}]   ;;  %s1301_s4 = inlined_call_operand.<no memory space> [shape: f32[1,1], index: 4, kind: input, shape index: {}]   ;;  %s1302_s5 = inlined_call_operand.vmem [shape: f32[8,1], index: 5, kind: output, shape index: {}]  }
   0x1   :  { %v10_v0 = vstv %s1301_s4 }
   0x2   :  { %11 = vst [vmem:[#allocation2] sm:$0x1] %v10_v0 }
   0x3   :  { %12 = vsyncpa [#allocation4], 0 }
   0x4   :  { %13 = vsyncpa [#allocation6], 0  ;;  %s883_s20 = smov [#allocation3]   ;;  %s884_s22 = smov [#allocation5]  }
   0x5   :  { %s20_s21 = sshll.u32 %s883_s20, 4  ;;  %s29_s23 = sshll.u32 %s884_s22, 4  ;;  %s21_s21 = int_to_ptr.vmem [resolvable:$true] %s20_s21  ;;  %s923_s23 = int_to_ptr.vmem [resolvable:$true] %s29_s23 }
   0x6   :  { %s835_s26 = scalar_lea.hbm %s1297_s0, 256 }
   0x7   :  { %p836_p0 = scmp.ne.s32.totalorder %s1297_s0, %s835_s26  ;;  %p839_p1 = scmp.lt.u32.totalorder %s835_s26, %s1297_s0 }
   0x9   :  { %p841_p2 = pnand %p839_p1, %p836_p0 }
   0xb   :  { %844 = shalt.err (!%p841_p2)
}
   0xc   :  { %s845_s30 = scalar_lea.vmem %s21_s21, 256  ;;  %p850_p4 = scmp.lt.s32.totalorder %s21_s21, %s21_s21 }
   0xd   :  { %p846_p3 = scmp.ne.s32.totalorder %s21_s21, %s845_s30  ;;  %p851_p5 = scmp.lt.s32.totalorder %s845_s30, %s845_s30 }
   0xf   :  { %p852_p6 = por %p851_p5, %p850_p4 }
  0x11   :  { %p853_p7 = pnand %p852_p6, %p846_p3 }
  0x13   :  { %856 = shalt.err (!%p853_p7)
}
  0x14   :  { %23 = dma.hbm_to_vmem [thread:$0]  %s1297_s0, 256, %s21_s21, [#allocation4]  }
  0x15   :  { %s857_s10 = scalar_lea.hbm %s1298_s1, 1280 }
  0x16   :  { %p858_p8 = scmp.ne.s32.totalorder %s1298_s1, %s857_s10  ;;  %p861_p9 = scmp.lt.u32.totalorder %s857_s10, %s1298_s1 }
  0x18   :  { %p863_p10 = pnand %p861_p9, %p858_p8 }
  0x1a   :  { %866 = shalt.err (!%p863_p10)
}
  0x1b   :  { %s867_s15 = scalar_lea.vmem %s923_s23, 1280  ;;  %p872_p12 = scmp.lt.s32.totalorder %s923_s23, %s923_s23 }
  0x1c   :  { %p868_p11 = scmp.ne.s32.totalorder %s923_s23, %s867_s15  ;;  %p873_p13 = scmp.lt.s32.totalorder %s867_s15, %s867_s15 }
  0x1e   :  { %p874_p0 = por %p873_p13, %p872_p12 }
  0x20   :  { %p875_p1 = pnand %p874_p0, %p868_p11 }
  0x22   :  { %878 = shalt.err (!%p875_p1)
}
  0x23   :  { %s885_s0 = smov 64   ;;  %s886_s16 = smov 4  }
  0x24   :  { %35 = dma.hbm_to_vmem [thread:$0]  %s1298_s1, 1280, %s923_s23, [#allocation6], %s885_s0, %s885_s0, %s886_s16  }
  0x25   :  { %879 = dma.done.wait [#allocation4], 256  }
  0x26   :  { %880 = vsyncadd [#allocation4], 4294967040 }
  0x27   :  { %881 = dma.done.wait [#allocation6], 1280  }
  0x28   :  { %882 = vsyncadd [#allocation6], 4294966016  ;;  %v887_v1 = vmov 0   ;;  %v69_v2 = vld [vmem:[#allocation3] sm:$0xff]  ;;  %v960_v4 = vld [vmem:[#allocation5] sm:$0xff]   ;;  %vm136_vm0 = vcmask 261120  }
  0x29   :  { %140 = vmatprep.subr.bf16.mxu0 %v887_v1  ;;  %190 = vmatprep.subr.bf16.mxu1 %v887_v1  ;;  %v958_v3 = vcombine.low %v69_v2, %v69_v2  ;;  %s888_s19 = smov 96   ;;  %v777_v5 = vcombine.high %v69_v2, %v69_v2  ;;  %v967_v6 = vld [vmem:[#allocation5 + $0x8] sm:$0xff]   ;;  %v976_v7 = vld [vmem:[#allocation5 + $0x10] sm:$0xff]   ;;  %s889_s1 = smov 32   ;;  %v989_v11 = vld [vmem:[#allocation5 + $0x18] sm:$0xff]   ;;  %vm235_vm1 = vcmask 523264  }
  0x2a   :  { %141 = vmatpush1.bf16.msra.mxu0 %v960_v4  ;;  %191 = vmatpush1.bf16.msra.mxu1 %v960_v4  ;;  %v333_v8 = vld [vmem:[#allocation3 + $0x4] sm:$0xff]  ;;  %v999_v12 = vld [vmem:[#allocation5 + $0x20] sm:$0xff]   ;;  %v1009_v13 = vld [vmem:[#allocation5 + $0x28] sm:$0xff]   ;;  %vm184_vm2 = vcmask 785408   ;;  %vm768_vm3 = vcmask 7168  }
  0x2b   :  { %180 = vrot.lane.b32.xlu0 %v958_v3, %s888_s19  ;;  %231 = vrot.lane.b32.xlu1 %v958_v3, %s885_s0  ;;  %v984_v9 = vcombine.high %v333_v8, %v333_v8  ;;  %v986_v10 = vcombine.low %v333_v8, %v333_v8  ;;  %v1019_v14 = vld [vmem:[#allocation5 + $0x30] sm:$0xff]   ;;  %v1025_v15 = vld [vmem:[#allocation5 + $0x38] sm:$0xff]   ;;  %v1031_v16 = vld [vmem:[#allocation5 + $0x40] sm:$0xff]  }
  0x2c   :  { %142 = vmatprep.subr.bf16.mxu0 %v887_v1  ;;  %788 = vmatprep.mubr.msk.bf16.mxu0 %vm136_vm0, %v777_v5  ;;  %v534_v17 = vld [vmem:[#allocation3 + $0x8] sm:$0xff]  ;;  %v1041_v20 = vld [vmem:[#allocation5 + $0x48] sm:$0xff]  }
  0x2d   :  { %192 = vmatprep.subr.bf16.mxu1 %v887_v1  ;;  %v1036_v18 = vcombine.high %v534_v17, %v534_v17  ;;  %v1038_v19 = vcombine.low %v534_v17, %v534_v17 }
  0x2e   :  { %143 = vmatpush1.bf16.msra.mxu0 %v967_v6  ;;  %193 = vmatpush1.bf16.msra.mxu1 %v967_v6 }
  0x2f   :  { %182 = vrot.lane.b32.xlu0 %v777_v5, %s888_s19  ;;  %233 = vrot.lane.b32.xlu1 %v777_v5, %s885_s0 }
  0x30   :  { %144 = vmatprep.subr.bf16.mxu0 %v887_v1  ;;  %194 = vmatprep.subr.bf16.mxu1 %v887_v1 }
  0x32   :  { %145 = vmatpush1.bf16.msra.mxu0 %v976_v7  ;;  %195 = vmatpush1.bf16.msra.mxu1 %v976_v7 }
  0x33   :  { %284 = vrot.lane.b32.xlu1 %v777_v5, %s889_s1  ;;  %282 = vrot.lane.b32.xlu0 %v958_v3, %s889_s1 }
  0x34   :  { %146 = vmatprep.subr.bf16.mxu0 %v887_v1  ;;  %196 = vmatprep.subr.bf16.mxu1 %v887_v1 }
  0x36   :  { %147 = vmatpush1.bf16.msra.mxu0 %v989_v11  ;;  %197 = vmatpush1.bf16.msra.mxu1 %v989_v11 }
  0x37   :  { %386 = vrot.lane.b32.xlu1 %v984_v9, %s888_s19  ;;  %384 = vrot.lane.b32.xlu0 %v986_v10, %s888_s19 }
  0x38   :  { %148 = vmatprep.subr.bf16.mxu0 %v887_v1  ;;  %198 = vmatprep.subr.bf16.mxu1 %v887_v1 }
  0x3a   :  { %149 = vmatpush1.bf16.msra.mxu0 %v999_v12  ;;  %199 = vmatpush1.bf16.msra.mxu1 %v999_v12 }
  0x3b   :  { %436 = vrot.lane.b32.xlu1 %v984_v9, %s885_s0  ;;  %434 = vrot.lane.b32.xlu0 %v986_v10, %s885_s0 }
  0x3c   :  { %150 = vmatprep.subr.bf16.mxu0 %v887_v1  ;;  %200 = vmatprep.subr.bf16.mxu1 %v887_v1 }
  0x3e   :  { %151 = vmatpush1.bf16.msra.mxu0 %v1009_v13  ;;  %201 = vmatpush1.bf16.msra.mxu1 %v1009_v13 }
  0x3f   :  { %486 = vrot.lane.b32.xlu1 %v984_v9, %s889_s1  ;;  %484 = vrot.lane.b32.xlu0 %v986_v10, %s889_s1 }
  0x40   :  { %152 = vmatprep.subr.bf16.mxu0 %v887_v1  ;;  %202 = vmatprep.subr.bf16.mxu1 %v887_v1 }
  0x42   :  { %153 = vmatpush1.bf16.msra.mxu0 %v1019_v14  ;;  %203 = vmatpush1.bf16.msra.mxu1 %v1019_v14 }
  0x43   :  { %154 = vmatprep.subr.bf16.mxu0 %v887_v1  ;;  %204 = vmatprep.subr.bf16.mxu1 %v887_v1 }
  0x44   :  { %587 = vrot.lane.b32.xlu1 %v1036_v18, %s888_s19  ;;  %585 = vrot.lane.b32.xlu0 %v1038_v19, %s888_s19 }
  0x46   :  { %155 = vmatpush1.bf16.msra.mxu0 %v1025_v15  ;;  %205 = vmatpush1.bf16.msra.mxu1 %v1025_v15 }
  0x47   :  { %156 = vmatprep.subr.bf16.mxu0 %v887_v1  ;;  %206 = vmatprep.subr.bf16.mxu1 %v887_v1 }
  0x48   :  { %637 = vrot.lane.b32.xlu1 %v1036_v18, %s885_s0  ;;  %635 = vrot.lane.b32.xlu0 %v1038_v19, %s885_s0 }
  0x4a   :  { %157 = vmatpush1.bf16.msra.mxu0 %v1031_v16  ;;  %207 = vmatpush1.bf16.msra.mxu1 %v1031_v16 }
  0x4b   :  { %158 = vmatprep.subr.bf16.mxu0 %v887_v1  ;;  %208 = vmatprep.subr.bf16.mxu1 %v887_v1 }
  0x4c   :  { %687 = vrot.lane.b32.xlu1 %v1036_v18, %s889_s1  ;;  %685 = vrot.lane.b32.xlu0 %v1038_v19, %s889_s1 }
  0x4e   :  { %159 = vmatpush1.bf16.msra.mxu0 %v1041_v20  ;;  %209 = vmatpush1.bf16.msra.mxu1 %v1041_v20 }
  0x4f   :  { %241 = vmatprep.subr.bf16.mxu0 %v887_v1  ;;  %292 = vmatprep.subr.bf16.mxu1 %v887_v1 }
  0x51   :  { %173 = vmatmul.mubr.bf16.vlgmr.msra.gmra.mrb[0].mxu0 %v958_v3 }
  0x52   :  { %242 = vmatpush1.bf16.msra.mxu0 %v960_v4 }
  0x53   :  { %243 = vmatprep.subr.bf16.mxu0 %v887_v1 }
  0x56   :  { %244 = vmatpush1.bf16.msra.mxu0 %v967_v6 }
  0x57   :  { %245 = vmatprep.subr.bf16.mxu0 %v887_v1 }
  0x5a   :  { %246 = vmatpush1.bf16.msra.mxu0 %v976_v7 }
  0x5b   :  { %247 = vmatprep.subr.bf16.mxu0 %v887_v1 }
  0x5e   :  { %248 = vmatpush1.bf16.msra.mxu0 %v989_v11 }
  0x5f   :  { %249 = vmatprep.subr.bf16.mxu0 %v887_v1 }
  0x62   :  { %250 = vmatpush1.bf16.msra.mxu0 %v999_v12 }
  0x63   :  { %251 = vmatprep.subr.bf16.mxu0 %v887_v1 }
  0x66   :  { %252 = vmatpush1.bf16.msra.mxu0 %v1009_v13 }
  0x67   :  { %253 = vmatprep.subr.bf16.mxu0 %v887_v1 }
  0x6a   :  { %254 = vmatpush1.bf16.msra.mxu0 %v1019_v14 }
  0x6b   :  { %255 = vmatprep.subr.bf16.mxu0 %v887_v1 }
  0x6e   :  { %256 = vmatpush1.bf16.msra.mxu0 %v1025_v15 }
  0x6f   :  { %257 = vmatprep.subr.bf16.mxu0 %v887_v1 }
  0x72   :  { %258 = vmatpush1.bf16.msra.mxu0 %v1031_v16 }
  0x73   :  { %259 = vmatprep.subr.bf16.mxu0 %v887_v1 }
  0x76   :  { %260 = vmatpush1.bf16.msra.mxu0 %v1041_v20 }
  0x77   :  { %343 = vmatprep.subr.bf16.mxu0 %v887_v1 }
  0x9d   :  { %v181_v21 = vpop.permute.xlu0 %180  ;;  %v232_v22 = vpop.permute.xlu1 %231 }
  0xa1   :  { %v183_v23 = vpop.permute.xlu0 %182  ;;  %v234_v24 = vpop.permute.xlu1 %233 }
  0xa2   :  { %789 = vmatprep.mubr.msk.bf16.mxu1 %vm136_vm0, %v183_v23  ;;  %v236_v25 = vsel %vm235_vm1, %v232_v22, %v234_v24  ;;  %v185_v26 = vsel %vm184_vm2, %v181_v21, %v183_v23  ;;  %790 = vmatprep.mubr.msk.bf16.mxu0 %vm136_vm0, %v234_v24 }
  0xa3   :  { %223 = vmatmul.mubr.bf16.vlgmr.msra.gmra.mrb[0].mxu1 %v185_v26  ;;  %274 = vmatmul.mubr.bf16.vlgmr.msra.gmra.mrb[4].mxu0 %v236_v25 }
  0xa4   :  { %293 = vmatpush1.bf16.msra.mxu1 %v960_v4  ;;  %344 = vmatpush1.bf16.msra.mxu0 %v960_v4 }
  0xa5   :  { %294 = vmatprep.subr.bf16.mxu1 %v887_v1  ;;  %345 = vmatprep.subr.bf16.mxu0 %v887_v1  ;;  %v285_v27 = vpop.permute.xlu1 %284  ;;  %v283_v28 = vpop.permute.xlu0 %282 }
  0xa6   :  { %791 = vmatprep.mubr.msk.bf16.mxu1 %vm136_vm0, %v285_v27  ;;  %794 = vmatprep.mubr.msk.bf16.mxu0 %vm136_vm0, %v984_v9  ;;  %v287_v30 = vsel %vm136_vm0, %v283_v28, %v285_v27 }
  0xa8   :  { %295 = vmatpush1.bf16.msra.mxu1 %v967_v6  ;;  %346 = vmatpush1.bf16.msra.mxu0 %v967_v6 }
  0xa9   :  { %296 = vmatprep.subr.bf16.mxu1 %v887_v1  ;;  %347 = vmatprep.subr.bf16.mxu0 %v887_v1  ;;  %v387_v29 = vpop.permute.xlu1 %386  ;;  %v385_v32 = vpop.permute.xlu0 %384 }
  0xaa   :  { %v388_v34 = vsel %vm184_vm2, %v385_v32, %v387_v29 }
  0xac   :  { %297 = vmatpush1.bf16.msra.mxu1 %v976_v7  ;;  %348 = vmatpush1.bf16.msra.mxu0 %v976_v7 }
  0xad   :  { %298 = vmatprep.subr.bf16.mxu1 %v887_v1  ;;  %349 = vmatprep.subr.bf16.mxu0 %v887_v1  ;;  %v437_v31 = vpop.permute.xlu1 %436  ;;  %v435_v33 = vpop.permute.xlu0 %434 }
  0xae   :  { %v438_v35 = vsel %vm235_vm1, %v435_v33, %v437_v31 }
  0xb0   :  { %299 = vmatpush1.bf16.msra.mxu1 %v989_v11  ;;  %350 = vmatpush1.bf16.msra.mxu0 %v989_v11 }
  0xb1   :  { %300 = vmatprep.subr.bf16.mxu1 %v887_v1  ;;  %351 = vmatprep.subr.bf16.mxu0 %v887_v1  ;;  %v487_v36 = vpop.permute.xlu1 %486  ;;  %v485_v37 = vpop.permute.xlu0 %484 }
  0xb2   :  { %v488_v39 = vsel %vm136_vm0, %v485_v37, %v487_v36 }
  0xb4   :  { %301 = vmatpush1.bf16.msra.mxu1 %v999_v12  ;;  %352 = vmatpush1.bf16.msra.mxu0 %v999_v12 }
  0xb5   :  { %302 = vmatprep.subr.bf16.mxu1 %v887_v1  ;;  %353 = vmatprep.subr.bf16.mxu0 %v887_v1 }
  0xb6   :  { %v588_v38 = vpop.permute.xlu1 %587  ;;  %v586_v45 = vpop.permute.xlu0 %585 }
  0xb7   :  { %v589_v47 = vsel %vm184_vm2, %v586_v45, %v588_v38  ;;  %v805_v45 = vld [vmem:[%s1300_s3] ss:$0 sm:$0xff] }
  0xb8   :  { %303 = vmatpush1.bf16.msra.mxu1 %v1009_v13  ;;  %354 = vmatpush1.bf16.msra.mxu0 %v1009_v13 }
  0xb9   :  { %304 = vmatprep.subr.bf16.mxu1 %v887_v1  ;;  %355 = vmatprep.subr.bf16.mxu0 %v887_v1 }
  0xba   :  { %v638_v40 = vpop.permute.xlu1 %637  ;;  %v636_v46 = vpop.permute.xlu0 %635 }
  0xbb   :  { %v639_v48 = vsel %vm235_vm1, %v636_v46, %v638_v40 }
  0xbc   :  { %305 = vmatpush1.bf16.msra.mxu1 %v1019_v14  ;;  %356 = vmatpush1.bf16.msra.mxu0 %v1019_v14 }
  0xbd   :  { %306 = vmatprep.subr.bf16.mxu1 %v887_v1  ;;  %357 = vmatprep.subr.bf16.mxu0 %v887_v1 }
  0xbe   :  { %v688_v49 = vpop.permute.xlu1 %687  ;;  %v686_v50 = vpop.permute.xlu0 %685 }
  0xbf   :  { %v689_v51 = vsel %vm136_vm0, %v686_v50, %v688_v49 }
  0xc0   :  { %307 = vmatpush1.bf16.msra.mxu1 %v1025_v15  ;;  %358 = vmatpush1.bf16.msra.mxu0 %v1025_v15 }
  0xc1   :  { %308 = vmatprep.subr.bf16.mxu1 %v887_v1  ;;  %359 = vmatprep.subr.bf16.mxu0 %v887_v1 }
  0xc4   :  { %309 = vmatpush1.bf16.msra.mxu1 %v1031_v16  ;;  %360 = vmatpush1.bf16.msra.mxu0 %v1031_v16 }
  0xc5   :  { %310 = vmatprep.subr.bf16.mxu1 %v887_v1  ;;  %361 = vmatprep.subr.bf16.mxu0 %v887_v1 }
  0xc8   :  { %311 = vmatpush1.bf16.msra.mxu1 %v1041_v20  ;;  %362 = vmatpush1.bf16.msra.mxu0 %v1041_v20 }
  0xc9   :  { %393 = vmatprep.subr.bf16.mxu1 %v887_v1  ;;  %443 = vmatprep.subr.bf16.mxu0 %v887_v1 }
  0xcb   :  { %325 = vmatmul.mubr.bf16.vlgmr.msra.gmra.mrb[4].mxu1 %v287_v30  ;;  %376 = vmatmul.mubr.bf16.vlgmr.msra.gmra.mrb[8].mxu0 %v986_v10 }
  0xcc   :  { %394 = vmatpush1.bf16.msra.mxu1 %v960_v4  ;;  %444 = vmatpush1.bf16.msra.mxu0 %v960_v4 }
  0xcd   :  { %395 = vmatprep.subr.bf16.mxu1 %v887_v1  ;;  %445 = vmatprep.subr.bf16.mxu0 %v887_v1 }
  0xce   :  { %795 = vmatprep.mubr.msk.bf16.mxu1 %vm136_vm0, %v387_v29  ;;  %796 = vmatprep.mubr.msk.bf16.mxu0 %vm136_vm0, %v437_v31 }
  0xd0   :  { %396 = vmatpush1.bf16.msra.mxu1 %v967_v6  ;;  %446 = vmatpush1.bf16.msra.mxu0 %v967_v6 }
  0xd1   :  { %397 = vmatprep.subr.bf16.mxu1 %v887_v1  ;;  %447 = vmatprep.subr.bf16.mxu0 %v887_v1 }
  0xd4   :  { %398 = vmatpush1.bf16.msra.mxu1 %v976_v7  ;;  %448 = vmatpush1.bf16.msra.mxu0 %v976_v7 }
  0xd5   :  { %399 = vmatprep.subr.bf16.mxu1 %v887_v1  ;;  %449 = vmatprep.subr.bf16.mxu0 %v887_v1 }
  0xd8   :  { %400 = vmatpush1.bf16.msra.mxu1 %v989_v11  ;;  %450 = vmatpush1.bf16.msra.mxu0 %v989_v11 }
  0xd9   :  { %401 = vmatprep.subr.bf16.mxu1 %v887_v1  ;;  %451 = vmatprep.subr.bf16.mxu0 %v887_v1 }
  0xdc   :  { %402 = vmatpush1.bf16.msra.mxu1 %v999_v12  ;;  %452 = vmatpush1.bf16.msra.mxu0 %v999_v12 }
  0xdd   :  { %403 = vmatprep.subr.bf16.mxu1 %v887_v1  ;;  %453 = vmatprep.subr.bf16.mxu0 %v887_v1 }
  0xe0   :  { %404 = vmatpush1.bf16.msra.mxu1 %v1009_v13  ;;  %454 = vmatpush1.bf16.msra.mxu0 %v1009_v13 }
  0xe1   :  { %405 = vmatprep.subr.bf16.mxu1 %v887_v1  ;;  %455 = vmatprep.subr.bf16.mxu0 %v887_v1 }
  0xe4   :  { %406 = vmatpush1.bf16.msra.mxu1 %v1019_v14  ;;  %456 = vmatpush1.bf16.msra.mxu0 %v1019_v14 }
  0xe5   :  { %407 = vmatprep.subr.bf16.mxu1 %v887_v1  ;;  %457 = vmatprep.subr.bf16.mxu0 %v887_v1 }
  0xe8   :  { %408 = vmatpush1.bf16.msra.mxu1 %v1025_v15  ;;  %458 = vmatpush1.bf16.msra.mxu0 %v1025_v15 }
  0xe9   :  { %409 = vmatprep.subr.bf16.mxu1 %v887_v1  ;;  %459 = vmatprep.subr.bf16.mxu0 %v887_v1 }
  0xec   :  { %410 = vmatpush1.bf16.msra.mxu1 %v1031_v16  ;;  %460 = vmatpush1.bf16.msra.mxu0 %v1031_v16 }
  0xed   :  { %411 = vmatprep.subr.bf16.mxu1 %v887_v1  ;;  %461 = vmatprep.subr.bf16.mxu0 %v887_v1 }
  0xf0   :  { %412 = vmatpush1.bf16.msra.mxu1 %v1041_v20  ;;  %462 = vmatpush1.bf16.msra.mxu0 %v1041_v20 }
  0xf1   :  { %493 = vmatprep.subr.bf16.mxu1 %v887_v1  ;;  %544 = vmatprep.subr.bf16.mxu0 %v887_v1 }
  0xf3   :  { %426 = vmatmul.mubr.bf16.vlgmr.msra.gmra.mrb[8].mxu1 %v388_v34  ;;  %476 = vmatmul.mubr.bf16.vlgmr.msra.gmra.mrb[12].mxu0 %v438_v35 }
  0xf4   :  { %494 = vmatpush1.bf16.msra.mxu1 %v960_v4  ;;  %545 = vmatpush1.bf16.msra.mxu0 %v960_v4 }
  0xf5   :  { %495 = vmatprep.subr.bf16.mxu1 %v887_v1  ;;  %546 = vmatprep.subr.bf16.mxu0 %v887_v1 }
  0xf6   :  { %797 = vmatprep.mubr.msk.bf16.mxu1 %vm136_vm0, %v487_v36  ;;  %800 = vmatprep.mubr.msk.bf16.mxu0 %vm136_vm0, %v1036_v18 }
  0xf8   :  { %496 = vmatpush1.bf16.msra.mxu1 %v967_v6  ;;  %547 = vmatpush1.bf16.msra.mxu0 %v967_v6 }
  0xf9   :  { %497 = vmatprep.subr.bf16.mxu1 %v887_v1  ;;  %548 = vmatprep.subr.bf16.mxu0 %v887_v1 }
  0xfc   :  { %498 = vmatpush1.bf16.msra.mxu1 %v976_v7  ;;  %549 = vmatpush1.bf16.msra.mxu0 %v976_v7 }
  0xfd   :  { %499 = vmatprep.subr.bf16.mxu1 %v887_v1  ;;  %550 = vmatprep.subr.bf16.mxu0 %v887_v1 }
 0x100   :  { %500 = vmatpush1.bf16.msra.mxu1 %v989_v11  ;;  %551 = vmatpush1.bf16.msra.mxu0 %v989_v11 }
 0x101   :  { %501 = vmatprep.subr.bf16.mxu1 %v887_v1  ;;  %552 = vmatprep.subr.bf16.mxu0 %v887_v1 }
 0x104   :  { %502 = vmatpush1.bf16.msra.mxu1 %v999_v12  ;;  %553 = vmatpush1.bf16.msra.mxu0 %v999_v12 }
 0x105   :  { %503 = vmatprep.subr.bf16.mxu1 %v887_v1  ;;  %554 = vmatprep.subr.bf16.mxu0 %v887_v1 }
 0x108   :  { %504 = vmatpush1.bf16.msra.mxu1 %v1009_v13  ;;  %555 = vmatpush1.bf16.msra.mxu0 %v1009_v13 }
 0x109   :  { %505 = vmatprep.subr.bf16.mxu1 %v887_v1  ;;  %556 = vmatprep.subr.bf16.mxu0 %v887_v1 }
 0x10c   :  { %506 = vmatpush1.bf16.msra.mxu1 %v1019_v14  ;;  %557 = vmatpush1.bf16.msra.mxu0 %v1019_v14 }
 0x10d   :  { %507 = vmatprep.subr.bf16.mxu1 %v887_v1  ;;  %558 = vmatprep.subr.bf16.mxu0 %v887_v1 }
 0x110   :  { %508 = vmatpush1.bf16.msra.mxu1 %v1025_v15  ;;  %559 = vmatpush1.bf16.msra.mxu0 %v1025_v15 }
 0x111   :  { %509 = vmatprep.subr.bf16.mxu1 %v887_v1  ;;  %560 = vmatprep.subr.bf16.mxu0 %v887_v1 }
 0x114   :  { %510 = vmatpush1.bf16.msra.mxu1 %v1031_v16  ;;  %561 = vmatpush1.bf16.msra.mxu0 %v1031_v16 }
 0x115   :  { %511 = vmatprep.subr.bf16.mxu1 %v887_v1  ;;  %562 = vmatprep.subr.bf16.mxu0 %v887_v1 }
 0x118   :  { %512 = vmatpush1.bf16.msra.mxu1 %v1041_v20  ;;  %563 = vmatpush1.bf16.msra.mxu0 %v1041_v20 }
 0x119   :  { %594 = vmatprep.subr.bf16.mxu1 %v887_v1  ;;  %644 = vmatprep.subr.bf16.mxu0 %v887_v1 }
 0x11b   :  { %526 = vmatmul.mubr.bf16.vlgmr.msra.gmra.mrb[12].mxu1 %v488_v39  ;;  %577 = vmatmul.mubr.bf16.vlgmr.msra.gmra.mrb[16].mxu0 %v1038_v19  ;;  %v804_v39 = vld [vmem:[%s1299_s2] ss:$0 sm:$0xff] }
 0x11c   :  { %595 = vmatpush1.bf16.msra.mxu1 %v960_v4  ;;  %645 = vmatpush1.bf16.msra.mxu0 %v960_v4 }
 0x11d   :  { %596 = vmatprep.subr.bf16.mxu1 %v887_v1  ;;  %646 = vmatprep.subr.bf16.mxu0 %v887_v1 }
 0x11e   :  { %801 = vmatprep.mubr.msk.bf16.mxu1 %vm136_vm0, %v588_v38  ;;  %802 = vmatprep.mubr.msk.bf16.mxu0 %vm136_vm0, %v638_v40 }
 0x120   :  { %597 = vmatpush1.bf16.msra.mxu1 %v967_v6  ;;  %647 = vmatpush1.bf16.msra.mxu0 %v967_v6 }
 0x121   :  { %598 = vmatprep.subr.bf16.mxu1 %v887_v1  ;;  %648 = vmatprep.subr.bf16.mxu0 %v887_v1 }
 0x124   :  { %599 = vmatpush1.bf16.msra.mxu1 %v976_v7  ;;  %649 = vmatpush1.bf16.msra.mxu0 %v976_v7  ;;  %v1235_v41 = vpop.f32.mrb[0].mxu0 }
 0x125   :  { %600 = vmatprep.subr.bf16.mxu1 %v887_v1  ;;  %650 = vmatprep.subr.bf16.mxu0 %v887_v1  ;;  %v176_v42 = vpop.f32.mrb[1].mxu0 }
 0x126   :  { %v177_v43 = vpop.f32.mrb[2].mxu0 }
 0x127   :  { %v178_v44 = vpop.f32.mrb[3].mxu0 }
 0x128   :  { %601 = vmatpush1.bf16.msra.mxu1 %v989_v11  ;;  %651 = vmatpush1.bf16.msra.mxu0 %v989_v11 }
 0x129   :  { %602 = vmatprep.subr.bf16.mxu1 %v887_v1  ;;  %652 = vmatprep.subr.bf16.mxu0 %v887_v1 }
 0x12c   :  { %603 = vmatpush1.bf16.msra.mxu1 %v999_v12  ;;  %653 = vmatpush1.bf16.msra.mxu0 %v999_v12 }
 0x12d   :  { %604 = vmatprep.subr.bf16.mxu1 %v887_v1  ;;  %654 = vmatprep.subr.bf16.mxu0 %v887_v1 }
 0x130   :  { %605 = vmatpush1.bf16.msra.mxu1 %v1009_v13  ;;  %655 = vmatpush1.bf16.msra.mxu0 %v1009_v13 }
 0x131   :  { %606 = vmatprep.subr.bf16.mxu1 %v887_v1  ;;  %656 = vmatprep.subr.bf16.mxu0 %v887_v1 }
 0x134   :  { %607 = vmatpush1.bf16.msra.mxu1 %v1019_v14  ;;  %657 = vmatpush1.bf16.msra.mxu0 %v1019_v14 }
 0x135   :  { %608 = vmatprep.subr.bf16.mxu1 %v887_v1  ;;  %658 = vmatprep.subr.bf16.mxu0 %v887_v1 }
 0x138   :  { %609 = vmatpush1.bf16.msra.mxu1 %v1025_v15  ;;  %659 = vmatpush1.bf16.msra.mxu0 %v1025_v15 }
 0x139   :  { %610 = vmatprep.subr.bf16.mxu1 %v887_v1  ;;  %660 = vmatprep.subr.bf16.mxu0 %v887_v1 }
 0x13c   :  { %611 = vmatpush1.bf16.msra.mxu1 %v1031_v16  ;;  %661 = vmatpush1.bf16.msra.mxu0 %v1031_v16 }
 0x13d   :  { %612 = vmatprep.subr.bf16.mxu1 %v887_v1  ;;  %662 = vmatprep.subr.bf16.mxu0 %v887_v1 }
 0x140   :  { %613 = vmatpush1.bf16.msra.mxu1 %v1041_v20  ;;  %663 = vmatpush1.bf16.msra.mxu0 %v1041_v20 }
 0x141   :  { %694 = vmatprep.subr.bf16.mxu1 %v887_v1 }
 0x143   :  { %627 = vmatmul.mubr.bf16.vlgmr.msra.gmra.mrb[16].mxu1 %v589_v47  ;;  %677 = vmatmul.mubr.bf16.vlgmr.msra.gmra.mrb[20].mxu0 %v639_v48  ;;  %v806_v48 = vld [vmem:[#allocation2] ss:$0 sm:$0xff] }
 0x144   :  { %695 = vmatpush1.bf16.msra.mxu1 %v960_v4  ;;  %803 = vmatprep.mubr.msk.bf16.mxu1 %vm136_vm0, %v688_v49 }
 0x145   :  { %696 = vmatprep.subr.bf16.mxu1 %v887_v1 }
 0x148   :  { %697 = vmatpush1.bf16.msra.mxu1 %v967_v6 }
 0x149   :  { %698 = vmatprep.subr.bf16.mxu1 %v887_v1 }
 0x14c   :  { %699 = vmatpush1.bf16.msra.mxu1 %v976_v7 }
 0x14d   :  { %700 = vmatprep.subr.bf16.mxu1 %v887_v1 }
 0x150   :  { %701 = vmatpush1.bf16.msra.mxu1 %v989_v11 }
 0x151   :  { %702 = vmatprep.subr.bf16.mxu1 %v887_v1 }
 0x154   :  { %703 = vmatpush1.bf16.msra.mxu1 %v999_v12 }
 0x155   :  { %704 = vmatprep.subr.bf16.mxu1 %v887_v1 }
 0x158   :  { %705 = vmatpush1.bf16.msra.mxu1 %v1009_v13 }
 0x159   :  { %706 = vmatprep.subr.bf16.mxu1 %v887_v1 }
 0x15c   :  { %707 = vmatpush1.bf16.msra.mxu1 %v1019_v14 }
 0x15d   :  { %708 = vmatprep.subr.bf16.mxu1 %v887_v1 }
 0x160   :  { %709 = vmatpush1.bf16.msra.mxu1 %v1025_v15 }
 0x161   :  { %710 = vmatprep.subr.bf16.mxu1 %v887_v1 }
 0x164   :  { %711 = vmatpush1.bf16.msra.mxu1 %v1031_v16 }
 0x165   :  { %712 = vmatprep.subr.bf16.mxu1 %v887_v1 }
 0x168   :  { %713 = vmatpush1.bf16.msra.mxu1 %v1041_v20 }
 0x16b   :  { %727 = vmatmul.mubr.bf16.vlgmr.msra.gmra.mrb[20].mxu1 %v689_v51 }
 0x176   :  { %v224_v52 = vpop.f32.mrb[0].mxu1  ;;  %v275_v53 = vpop.f32.mrb[4].mxu0 }
 0x177   :  { %v230_v54 = vmax.f32 %v1235_v41, %v224_v52  ;;  %v226_v55 = vpop.f32.mrb[1].mxu1  ;;  %v277_v56 = vpop.f32.mrb[5].mxu0 }
 0x178   :  { %v227_v57 = vpop.f32.mrb[2].mxu1  ;;  %v278_v58 = vpop.f32.mrb[6].mxu0 }
 0x179   :  { %v281_v59 = vmax.f32 %v230_v54, %v275_v53  ;;  %v228_v60 = vpop.f32.mrb[3].mxu1  ;;  %v279_v61 = vpop.f32.mrb[7].mxu0 }
 0x19e   :  { %v326_v62 = vpop.f32.mrb[4].mxu1  ;;  %v377_v63 = vpop.f32.mrb[8].mxu0 }
 0x19f   :  { %v332_v0 = vmax.f32 %v281_v59, %v326_v62  ;;  %v328_v1 = vpop.f32.mrb[5].mxu1  ;;  %v379_v2 = vpop.f32.mrb[9].mxu0 }
 0x1a0   :  { %v329_v3 = vpop.f32.mrb[6].mxu1  ;;  %v380_v4 = vpop.f32.mrb[10].mxu0 }
 0x1a1   :  { %v383_v5 = vmax.f32 %v332_v0, %v377_v63  ;;  %v330_v6 = vpop.f32.mrb[7].mxu1  ;;  %v381_v7 = vpop.f32.mrb[11].mxu0 }
 0x1c6   :  { %v427_v8 = vpop.f32.mrb[8].mxu1  ;;  %v477_v9 = vpop.f32.mrb[12].mxu0 }
 0x1c7   :  { %v433_v10 = vmax.f32 %v383_v5, %v427_v8  ;;  %v429_v11 = vpop.f32.mrb[9].mxu1  ;;  %v479_v12 = vpop.f32.mrb[13].mxu0 }
 0x1c8   :  { %v430_v13 = vpop.f32.mrb[10].mxu1  ;;  %v480_v14 = vpop.f32.mrb[14].mxu0 }
 0x1c9   :  { %v483_v15 = vmax.f32 %v433_v10, %v477_v9  ;;  %v431_v16 = vpop.f32.mrb[11].mxu1  ;;  %v481_v17 = vpop.f32.mrb[15].mxu0 }
 0x1ee   :  { %v527_v18 = vpop.f32.mrb[12].mxu1  ;;  %v578_v19 = vpop.f32.mrb[16].mxu0 }
 0x1ef   :  { %v533_v20 = vmax.f32 %v483_v15, %v527_v18  ;;  %v529_v21 = vpop.f32.mrb[13].mxu1  ;;  %v580_v22 = vpop.f32.mrb[17].mxu0 }
 0x1f0   :  { %v530_v23 = vpop.f32.mrb[14].mxu1  ;;  %v581_v24 = vpop.f32.mrb[18].mxu0 }
 0x1f1   :  { %v584_v25 = vmax.f32 %v533_v20, %v578_v19  ;;  %v531_v26 = vpop.f32.mrb[15].mxu1  ;;  %v582_v27 = vpop.f32.mrb[19].mxu0 }
 0x216   :  { %v628_v28 = vpop.f32.mrb[16].mxu1  ;;  %v678_v29 = vpop.f32.mrb[20].mxu0 }
 0x217   :  { %v634_v30 = vmax.f32 %v584_v25, %v628_v28  ;;  %v630_v31 = vpop.f32.mrb[17].mxu1  ;;  %v680_v32 = vpop.f32.mrb[21].mxu0 }
 0x218   :  { %v631_v33 = vpop.f32.mrb[18].mxu1  ;;  %v681_v34 = vpop.f32.mrb[22].mxu0 }
 0x219   :  { %v684_v35 = vmax.f32 %v634_v30, %v678_v29  ;;  %v632_v36 = vpop.f32.mrb[19].mxu1  ;;  %v682_v37 = vpop.f32.mrb[23].mxu0 }
 0x23e   :  { %v728_v38 = vpop.f32.mrb[20].mxu1 }
 0x23f   :  { %v734_v40 = vmax.f32 %v684_v35, %v728_v38  ;;  %v730_v41 = vpop.f32.mrb[21].mxu1 }
 0x240   :  { %v731_v42 = vpop.f32.mrb[22].mxu1 }
 0x241   :  { %v742_v43 = vadd.f32 %v804_v39, %v734_v40  ;;  %v732_v44 = vpop.f32.mrb[23].mxu1 }
 0x243   :  { %v743_v46 = vmax.f32 %v742_v43, 0.0 }
 0x245   :  { %v751_v47 = vmul.f32 %v805_v45, %v743_v46 }
 0x247   :  { %752 = vadd.xlane.f32.xlu0 %v751_v47 }
 0x2d4   :  { %v753_v49 = vpop.xlane.xlu0 %752 }
 0x2d5   :  { %v761_v50 = vadd.f32 %v806_v48, %v753_v49 }
 0x2d7   :  { %v807_v51 = vmul.f32 -1.442695, %v761_v50 }
 0x2d9   :  { %831 = vpow2.f32 %v807_v51 }
 0x2e3   :  { %v832_v52 = vpop.eup %831 }
 0x2e4   :  { %v765_v53 = vadd.f32 1.0, %v832_v52 }
 0x2e6   :  { %833 = vrcp.f32 %v765_v53 }
 0x2f0   :  { %v834_v54 = vpop.eup %833 }
 0x2f1   :  { %769 = vst.msk [vmem:[%s1302_s5] sm:$0xff] %vm768_vm3, %v834_v54 }
 0x2f2   :  { %774 = vsyncpa [#allocation4], 1 }
 0x2f3   :  { %775 = vsyncpa [#allocation6], 1 }

</bundles_post_ra>
